<compile_context>
chip_gen: v6e
topology: v6e:2x2x1
jax: 0.10.0
libtpu: 0.0.40
codegen_flags: <defaults>
</compile_context>

<pallas_src>
import functools

import jax
import jax.numpy as jnp
from jax.experimental import pallas as pl
from jax.experimental.pallas import tpu as pltpu


def _cdiv(a, b):
    return -(-a // b)


def _round_up(a, b):
    return _cdiv(a, b) * b


def _x_pow_p(x, p):
    """x ** p (x is f32). Statically specialized on p."""
    pf = float(p)
    if pf.is_integer() and 1.0 <= pf <= 64.0:
        # Binary exponentiation: VPU multiplies only (no EUP transcendentals),
        # and finite results for negative x when clamp=False (matches torch).
        n = int(pf)
        result = None
        base = x
        while n:
            if n & 1:
                result = base if result is None else result * base
            n >>= 1
            if n:
                base = base * base
        return result
    # General (non-integer) p: requires x > 0 (true after clamp).
    return jnp.exp(jnp.float32(pf) * jnp.log(x))


def _gem_pool_single_kernel(x_ref, o_ref, *, p, eps, clamp, hw):
    """Single reduction tile per row tile: block is (tm, hw), hw = full width."""
    n_full = hw // 128
    rem = hw - n_full * 128

    def chunk_pow(lo, width):
        xx = x_ref[:, lo:lo + width].astype(jnp.float32)
        if clamp:
            xx = jnp.maximum(xx, jnp.float32(eps))
        return _x_pow_p(xx, p)

    s = None
    partial = None
    for j in range(n_full):                      # pure VPU adds, 128 lanes wide
        xp = chunk_pow(j * 128, 128)
        partial = xp if partial is None else partial + xp
    if partial is not None:
        s = jnp.sum(partial, axis=-1, keepdims=True)      # one XLU reduce
    if rem:
        t = jnp.sum(chunk_pow(n_full * 128, rem), axis=-1, keepdims=True)
        s = t if s is None else s + t

    m = s * jnp.float32(1.0 / hw)
    # m^(1/p): EUP exp/log on a (tm, 1) column only — negligible cost.
    o_ref[...] = jnp.exp(jnp.float32(1.0 / float(p)) * jnp.log(m)).astype(o_ref.dtype)


def _gem_pool_multi_kernel(x_ref, o_ref, acc_ref, *, p, eps, clamp, hw, tk, num_k):
    """Multiple reduction tiles: x_ref (tm, tk) with tk % 128 == 0,
    acc_ref (tm, 128) f32 lane-dense accumulator, o_ref (tm, 1)."""
    k = pl.program_id(1)
    n_chunks = tk // 128
    edge = hw - (num_k - 1) * tk          # valid columns in the last k tile

    @pl.when(k == 0)
    def _init():
        acc_ref[...] = jnp.zeros_like(acc_ref)

    def chunk_pow(j, valid_cols=None):
        xx = x_ref[:, j * 128:(j + 1) * 128].astype(jnp.float32)
        if clamp:
            xx = jnp.maximum(xx, jnp.float32(eps))
        xp = _x_pow_p(xx, p)
        if valid_cols is not None:
            col = jax.lax.broadcasted_iota(jnp.int32, xp.shape, 1) + j * 128
            xp = jnp.where(col < valid_cols, xp, jnp.float32(0.0))
        return xp

    def accumulate(last_tile):
        partial = None
        for j in range(n_chunks):
            lo = j * 128
            if last_tile and lo >= edge:
                break                              # chunk entirely past true H*W
            need_mask = last_tile and (lo + 128) > edge
            xp = chunk_pow(j, edge if need_mask else None)
            partial = xp if partial is None else partial + xp
        acc_ref[...] += partial                    # pure VPU adds, lane-dense

    if edge == tk:
        # hw divides evenly into k tiles: no masking anywhere.
        accumulate(last_tile=False)
    else:
        @pl.when(k < num_k - 1)
        def _full_tiles():
            accumulate(last_tile=False)

        @pl.when(k == num_k - 1)
        def _edge_tile():
            accumulate(last_tile=True)

    @pl.when(k == num_k - 1)
    def _finalize():
        s = jnp.sum(acc_ref[...], axis=-1, keepdims=True)   # single XLU reduce
        m = s * jnp.float32(1.0 / hw)
        o_ref[...] = jnp.exp(jnp.float32(1.0 / float(p)) * jnp.log(m)).astype(o_ref.dtype)


def _buffered_in_spec(block_shape, index_map, n_stream_steps):
    """Input BlockSpec; requests 3-deep pipelining when the stream is long enough."""
    if n_stream_steps >= 3 and hasattr(pl, "Buffered"):
        try:
            return pl.BlockSpec(block_shape, index_map, pipeline_mode=pl.Buffered(3))
        except TypeError:  # older/different BlockSpec signature — fall back
            pass
    return pl.BlockSpec(block_shape, index_map)


def gem_pool2d(x, p=3.0, eps=1e-6, clamp=True, *,
               block_bytes=4 * 1024 * 1024,        # per input block (x2-3 buffered)
               max_single_cols=4096,               # hw <= this -> single k tile
               multi_tile_cols_bytes=8192,         # bytes per row per k tile
               vmem_limit_bytes=48 * 1024 * 1024):
    """x: (N, C, H, W) -> (N, C), generalized-mean pooled over H, W."""
    n, c, h, w = x.shape
    nc, hw = n * c, h * w
    x2 = x.reshape(nc, hw)                         # contiguous view; no HBM copy

    itemsize = jnp.dtype(x.dtype).itemsize
    sub = {4: 8, 2: 16, 1: 32}.get(itemsize, 8)    # sublane packing unit

    # ---- Reduction (lane) axis tiling ----
    single = hw <= max_single_cols
    if single:
        tk, num_k = hw, 1                          # full-dim block; no 128 constraint
    else:
        tk = max(128, _round_up(multi_tile_cols_bytes // itemsize, 128))
        tk = min(tk, _round_up(hw, 128))
        num_k = _cdiv(hw, tk)                      # ragged last tile masked in-kernel

    # ---- Row (sublane) axis tiling from a VMEM byte budget ----
    tk_vmem = _round_up(tk, 128)                   # lanes pad to 128 in VMEM
    rows = max(sub, (block_bytes // (tk_vmem * itemsize)) // sub * sub)

    if nc <= sub:
        tm, num_i = nc, 1                          # full-dim row block
    else:
        tm = min(rows, _round_up(nc, sub))
        num_i = _cdiv(nc, tm)
        if num_i == 1:
            # Guarantee >=2 row tiles so both v7x TensorCores get work.
            tm = _round_up(_cdiv(nc, 2), sub)
            num_i = _cdiv(nc, tm)

    # ---- Cost hint (bytes actually streamed; no padding copies anymore) ----
    p_f = float(p)
    p_int = p_f.is_integer() and 1.0 <= p_f <= 64.0
    cost = pl.CostEstimate(
        flops=(2 + (int(p_f) if p_int else 2)) * nc * hw,
        transcendentals=(0 if p_int else 2 * nc * hw) + 2 * nc,
        bytes_accessed=nc * hw * itemsize + nc * itemsize,
    )

    if single:
        kernel = functools.partial(
            _gem_pool_single_kernel, p=p_f, eps=float(eps), clamp=bool(clamp), hw=hw)
        grid = (num_i,)
        in_specs = [_buffered_in_spec((tm, tk), lambda i: (i, 0), num_i)]
        out_specs = pl.BlockSpec((tm, 1), lambda i: (i, 0))
        scratch_shapes = []
        dims = ("parallel",)
    else:
        kernel = functools.partial(
            _gem_pool_multi_kernel, p=p_f, eps=float(eps), clamp=bool(clamp),
            hw=hw, tk=tk, num_k=num_k)
        grid = (num_i, num_k)                      # reduction axis LAST
        in_specs = [_buffered_in_spec((tm, tk), lambda i, k: (i, k), num_i * num_k)]
        out_specs = pl.BlockSpec((tm, 1), lambda i, k: (i, 0))
        scratch_shapes = [pltpu.VMEM((tm, 128), jnp.float32)]
        dims = ("parallel", "arbitrary")

    out = pl.pallas_call(
        kernel,
        out_shape=jax.ShapeDtypeStruct((nc, 1), x.dtype),
        grid_spec=pltpu.PrefetchScalarGridSpec(
            num_scalar_prefetch=0,
            grid=grid,
            in_specs=in_specs,
            out_specs=out_specs,
            scratch_shapes=scratch_shapes,
        ),
        compiler_params=pltpu.CompilerParams(
            dimension_semantics=dims,
            vmem_limit_bytes=int(vmem_limit_bytes)),
        cost_estimate=cost,
    )(x2)
    return out.reshape(n, c)


def gem_pool2d_ref(x, p=3.0, eps=1e-6, clamp=True):
    x = x.astype(jnp.float32)
    if clamp:
        x = jnp.maximum(x, eps)
    return jnp.power(jnp.mean(jnp.power(x, p), axis=(2, 3)), 1.0 / p)


if __name__ == "__main__":
    key = jax.random.PRNGKey(0)
    k1, k2, k3, k4, k5 = jax.random.split(key, 5)

    # Case 1: lane-friendly spatial map (16x16=256), f32, module defaults.
    x1 = jax.random.normal(k1, (2, 4, 16, 16), dtype=jnp.float32)
    y1 = jax.block_until_ready(gem_pool2d(x1, p=3.0, eps=1e-6, clamp=True))
    r1 = gem_pool2d_ref(x1)
    assert y1.shape == (2, 4), y1.shape
    assert jnp.allclose(y1, r1, atol=1e-5, rtol=1e-5), (y1, r1)

    # Case 2: canonical 7x7 GeM case (hw=49, not a multiple of 128) with odd
    # channel count — full-width k block, no padding, no masking.
    x2 = jax.random.normal(k2, (2, 3, 7, 7), dtype=jnp.float32)
    y2 = jax.block_until_ready(gem_pool2d(x2))
    r2 = gem_pool2d_ref(x2)
    assert y2.shape == (2, 3), y2.shape
    assert jnp.allclose(y2, r2, atol=1e-5, rtol=1e-5), (y2, r2)

    # Case 3: bf16 conv features stay bf16 over HBM; f32 accumulation inside.
    x3 = jax.random.normal(k3, (2, 4, 16, 16), dtype=jnp.bfloat16)
    y3 = jax.block_until_ready(gem_pool2d(x3))
    r3 = gem_pool2d_ref(x3)
    assert y3.dtype == jnp.bfloat16, y3.dtype
    assert jnp.allclose(y3.astype(jnp.float32), r3, atol=2e-2, rtol=2e-2), (y3, r3)

    # Case 4: enough channels to force >=2 row tiles (megacore split) plus a
    # row-overhang edge block whose outputs are dropped.
    x4 = jax.random.normal(k4, (2, 12, 7, 7), dtype=jnp.float32)
    y4 = jax.block_until_ready(gem_pool2d(x4))
    r4 = gem_pool2d_ref(x4)
    assert y4.shape == (2, 12), y4.shape
    assert jnp.allclose(y4, r4, atol=1e-5, rtol=1e-5), (y4, r4)

    # Case 5: large spatial map (72x72=5184 > 4096) -> multi-k-tile path with a
    # ragged last reduction tile (edge masking) and lane-dense accumulator.
    x5 = jax.random.normal(k5, (2, 3, 72, 72), dtype=jnp.float32)
    y5 = jax.block_until_ready(gem_pool2d(x5))
    r5 = gem_pool2d_ref(x5)
    assert y5.shape == (2, 3), y5.shape
    assert jnp.allclose(y5, r5, atol=1e-5, rtol=1e-5), (y5, r5)

    # Case 6: clamp=False path (positive inputs keep the root well-defined).
    x6 = jnp.abs(x1) + 0.1
    y6 = jax.block_until_ready(gem_pool2d(x6, clamp=False))
    r6 = gem_pool2d_ref(x6, clamp=False)
    assert jnp.allclose(y6, r6, atol=1e-5, rtol=1e-5), (y6, r6)

    print("KERNEL_OK")
</pallas_src>

<mosaic_0001>
module attributes {stable_mosaic.version = 11 : i64} {
  func.func @_gem_pool_single_kernel(%arg0: i32, %arg1: memref<8x256xf32, #tpu.memory_space<vmem>>, %arg2: memref<8x1xf32, #tpu.memory_space<vmem>>) attributes {dimension_semantics = [#tpu.dimension_semantics<parallel>], iteration_bounds = array<i64: 1>, scalar_prefetch = 0 : i64, scratch_operands = 0 : i64, tpu.core_type = #tpu.core_type<tc>, window_params = [{transform_indices = @transform_0, window_bounds = array<i64: 8, 256>}, {transform_indices = @transform_1, window_bounds = array<i64: 8, 1>}]} {
    %c0 = arith.constant 0 : index
    %c0_0 = arith.constant 0 : index
    %0 = vector.load %arg1[%c0, %c0_0] : memref<8x256xf32, #tpu.memory_space<vmem>>, vector<8x128xf32>
    %cst = arith.constant 9.99999997E-7 : f32
    %1 = vector.broadcast %cst : f32 to vector<8x128xf32>
    %2 = arith.maximumf %0, %1 : vector<8x128xf32>
    %3 = arith.mulf %2, %2 : vector<8x128xf32>
    %4 = arith.mulf %2, %3 : vector<8x128xf32>
    %c0_1 = arith.constant 0 : index
    %c128 = arith.constant 128 : index
    %5 = vector.load %arg1[%c0_1, %c128] : memref<8x256xf32, #tpu.memory_space<vmem>>, vector<8x128xf32>
    %cst_2 = arith.constant 9.99999997E-7 : f32
    %6 = vector.broadcast %cst_2 : f32 to vector<8x128xf32>
    %7 = arith.maximumf %5, %6 : vector<8x128xf32>
    %8 = arith.mulf %7, %7 : vector<8x128xf32>
    %9 = arith.mulf %7, %8 : vector<8x128xf32>
    %10 = arith.addf %4, %9 : vector<8x128xf32>
    %cst_3 = arith.constant dense<0.000000e+00> : vector<8xf32>
    %11 = vector.multi_reduction <add>, %10, %cst_3 [1] : vector<8x128xf32> to vector<8xf32>
    %12 = vector.shape_cast %11 : vector<8xf32> to vector<8x1xf32>
    %cst_4 = arith.constant 3.906250e-03 : f32
    %13 = vector.broadcast %cst_4 : f32 to vector<8x1xf32>
    %14 = arith.mulf %12, %13 : vector<8x1xf32>
    %15 = math.log %14 : vector<8x1xf32>
    %cst_5 = arith.constant 0.333333343 : f32
    %16 = vector.broadcast %cst_5 : f32 to vector<8x1xf32>
    %17 = arith.mulf %16, %15 : vector<8x1xf32>
    %18 = math.exp %17 : vector<8x1xf32>
    %c0_6 = arith.constant 0 : index
    %c0_7 = arith.constant 0 : index
    %19 = vector.load %arg2[%c0_6, %c0_7] : memref<8x1xf32, #tpu.memory_space<vmem>>, vector<8x1xf32>
    tpu.vector_store %arg2[%c0_6, %c0_7], %18 {strides = array<i32>} : memref<8x1xf32, #tpu.memory_space<vmem>>, vector<8x1xf32>,
    return
  }
  func.func @transform_0(%arg0: i32) -> (i32, i32) {
    %c0_i32 = arith.constant 0 : i32
    %c0_i32_0 = arith.constant 0 : i32
    return %arg0, %c0_i32 : i32, i32
  }
  func.func @transform_1(%arg0: i32) -> (i32, i32) {
    %c0_i32 = arith.constant 0 : i32
    %c0_i32_0 = arith.constant 0 : i32
    return %arg0, %c0_i32 : i32, i32
  }
}

</mosaic_0001>

<bundles_post_ra>
// kernel: tpu_custom_call.1
= control target key start
LH: loop header
LB: loop body
LE: loop exit
PB: predicated region body
PF: predicated region fallthrough
CT: control target
= control target key end

     0   :  { %6 = vsyncpa [#allocation3], 0  ;;  %s71_s6 = smov [#allocation2]   ;;  %s88_s0 = inlined_call_operand.hbm [shape: f32[8,256], index: 0, kind: input, shape index: {}]   ;;  %s89_s1 = inlined_call_operand.vmem [shape: f32[8,1], index: 1, kind: output, shape index: {}]  }
   0x1   :  { %s13_s7 = sshll.u32 %s71_s6, 4  ;;  %s14_s7 = int_to_ptr.vmem [resolvable:$true] %s13_s7 }
   0x2   :  { %s57_s8 = scalar_lea.vmem %s14_s7, 256  ;;  %p62_p1 = scmp.lt.s32.totalorder %s14_s7, %s14_s7 }
   0x3   :  { %p58_p0 = scmp.ne.s32.totalorder %s14_s7, %s57_s8  ;;  %p63_p2 = scmp.lt.s32.totalorder %s57_s8, %s57_s8 }
   0x5   :  { %p64_p3 = por %p63_p2, %p62_p1 }
   0x7   :  { %p65_p4 = pnand %p64_p3, %p58_p0 }
   0x9   :  { %68 = shalt.err (!%p65_p4)
}
   0xa   :  { %16 = dma.hbm_to_vmem [thread:$0]  %s88_s0, 256, %s14_s7, [#allocation3]  }
   0xb   :  { %69 = dma.done.wait [#allocation3], 256  }
   0xc   :  { %70 = vsyncadd [#allocation3], 4294967040  ;;  %v20_v0 = vld [vmem:[#allocation2] sm:$0xff]  ;;  %v24_v1 = vld [vmem:[#allocation2 + $0x8] sm:$0xff]  ;;  %vm37_vm0 = vcmask 7168  }
   0xd   :  { %v21_v2 = vmax.f32 %v20_v0, 1e-06  ;;  %v25_v3 = vmax.f32 %v24_v1, 1e-06 }
   0xf   :  { %v22_v4 = vmul.f32 %v21_v2, %v21_v2  ;;  %v26_v5 = vmul.f32 %v25_v3, %v25_v3 }
  0x11   :  { %v23_v6 = vmul.f32 %v22_v4, %v21_v2  ;;  %v27_v7 = vmul.f32 %v26_v5, %v25_v3 }
  0x13   :  { %v28_v8 = vadd.f32 %v27_v7, %v23_v6 }
  0x15   :  { %29 = vadd.xlane.f32.xlu0 %v28_v8 }
  0x9e   :  { %v30_v9 = vpop.xlane.xlu0 %29 }
  0x9f   :  { %v31_v10 = vmul.f32 0.00390625, %v30_v9 }
  0xa1   :  { %45 = vlog2.f32 %v31_v10 }
  0xae   :  { %v46_v11 = vpop.eup %45 }
  0xaf   :  { %v33_v12 = vmul.f32 0.6931472, %v46_v11 }
  0xb1   :  { %v34_v13 = vmul.f32 0.33333334, %v33_v12 }
  0xb3   :  { %v35_v14 = vmul.f32 1.442695, %v34_v13 }
  0xb5   :  { %47 = vpow2.f32 %v35_v14 }
  0xc2   :  { %v48_v15 = vpop.eup %47 }
  0xc3   :  { %38 = vst.msk [vmem:[%s89_s1] sm:$0xff] %vm37_vm0, %v48_v15 }
  0xc4   :  { %43 = vsyncpa [#allocation3], 1 }

</bundles_post_ra>
